<compile_context>
chip_gen: v5e
topology: v5e:2x2
jax: 0.10.0
libtpu: 0.0.40
codegen_flags: <defaults>
</compile_context>

<pallas_src>
import math
import functools

import jax
import jax.numpy as jnp
from jax.experimental import pallas as pl
from jax.experimental.pallas import tpu as pltpu


def decoder_decode_kernel(ids_ref,                 # [T, B] int32  (SMEM scalar prefetch)
                          h0_ref, c0_ref,          # [L, B, H] f32 (aliased to h_out/c_out)
                          emb_ref,                 # [V, E]  f32   embedding table
                          enc_ref,                 # [B, S, H] bf16
                          enc_t_ref,               # [B, H, S] bf16 (pre-transposed once)
                          w_ih_ref,                # [L, E, 4H] bf16
                          w_hh_ref,                # [L, H, 4H] bf16
                          b_ref,                   # [L, 4H] f32   (b_ih + b_hh)
                          w_out_ref,               # [H, Vp] bf16  (lane-padded)
                          b_out_ref,               # [1, Vp] f32   (-1e9 in padded cols)
                          pred_ref,                # [B, Vp] f32   (per-step block of [T,B,Vp])
                          h_out_ref, c_out_ref,    # [L, B, H] f32
                          h_st, c_st):             # VMEM scratch [L, B, H] f32 (carried state)
    t = pl.program_id(0)
    L, B, H = h_st.shape
    bf16 = jnp.bfloat16

    # Initialize carried state from the (aliased) inputs on the first decode step.
    @pl.when(t == 0)
    def _():
        h_st[...] = h0_ref[...]
        c_st[...] = c0_ref[...]

    # ---- Embedding gather in-kernel (ids from SMEM); dropout = identity in eval ----
    rows = [emb_ref[pl.ds(ids_ref[t, b], 1), :] for b in range(B)]
    x = jnp.concatenate(rows, axis=0).astype(bf16)                     # [B, E]

    # ---- Attention over all L layers (pre-update hidden), batched on the MXU ----
    hid_blh = jnp.stack([h_st[l] for l in range(L)], axis=1).astype(bf16)   # [B, L, H]
    scores = jnp.einsum("blh,bhs->bls", hid_blh, enc_t_ref[...],
                        preferred_element_type=jnp.float32)             # [B, L, S]
    scores = scores - jnp.max(scores, axis=-1, keepdims=True)
    ex = jnp.exp(scores)
    attw = ex * pl.reciprocal(jnp.sum(ex, axis=-1, keepdims=True), approx=True)
    h_att = jnp.tanh(jnp.einsum("bls,bsh->blh", attw.astype(bf16), enc_ref[...],
                                preferred_element_type=jnp.float32))    # [B, L, H] f32

    # ---- Recurrent (h) half of the gate matmul for ALL layers, hoisted off the
    #      serial x-chain (only the x-half is layer-to-layer dependent) ----
    hh = [jnp.dot(h_att[:, l, :].astype(bf16), w_hh_ref[l],
                  preferred_element_type=jnp.float32) for l in range(L)]     # L x [B, 4H]

    b_all = b_ref[...]                                                   # [L, 4H]

    # ---- Serial LSTM layer chain (single timestep), gate order i, f, g, o ----
    for l in range(L):
        gates = (jnp.dot(x, w_ih_ref[l], preferred_element_type=jnp.float32)
                 + hh[l] + b_all[l:l + 1, :])                            # [B, 4H] f32
        if_sig = jax.nn.sigmoid(gates[:, :2 * H])     # sigmoid only on i|f slab
        i_g = if_sig[:, :H]
        f_g = if_sig[:, H:]
        g_g = jnp.tanh(gates[:, 2 * H:3 * H])         # tanh only on g
        o_g = jax.nn.sigmoid(gates[:, 3 * H:])        # sigmoid on o
        c_new = f_g * c_st[l] + i_g * g_g
        h_new = o_g * jnp.tanh(c_new)
        h_st[l] = h_new                               # per-layer state write
        c_st[l] = c_new
        x = h_new.astype(bf16)                        # inter-layer dropout = identity (eval)

    # ---- Output projection for this step (lane-dense padded slab) ----
    pred_ref[...] = (jnp.dot(x, w_out_ref[...], preferred_element_type=jnp.float32)
                     + b_out_ref[...])

    # Final h/c land once, after the last step, into the aliased output buffers.
    @pl.when(t == pl.num_programs(0) - 1)
    def _():
        h_out_ref[...] = h_st[...]
        c_out_ref[...] = c_st[...]


def prepare_decoder_params(params):
    """One-time parameter prep (outside the decode loop): transposes, bias pre-add,
    bf16 casts for MXU operands, lane-dense output padding (-1e9 bias in padded cols)."""
    w_ih = params["w_ih"]                            # [L, 4H, E]
    w_hh = params["w_hh"]                            # [L, 4H, H]
    H = w_hh.shape[2]
    V = params["w_out"].shape[0]
    Vp = max(128, pl.cdiv(V, 128) * 128)

    w_ih_t = jnp.transpose(w_ih, (0, 2, 1)).astype(jnp.bfloat16)        # [L, E, 4H]
    w_hh_t = jnp.transpose(w_hh, (0, 2, 1)).astype(jnp.bfloat16)        # [L, H, 4H]
    b_gates = (params["b_ih"] + params["b_hh"]).astype(jnp.float32)     # [L, 4H]
    w_out_t = jnp.transpose(params["w_out"]).astype(jnp.float32)        # [H, V]
    w_out_pad = (jnp.zeros((H, Vp), jnp.float32).at[:, :V].set(w_out_t)
                 .astype(jnp.bfloat16))
    b_out_pad = (jnp.full((1, Vp), -1e9, jnp.float32)
                 .at[:, :V].set(params["b_out"].astype(jnp.float32)[None, :]))
    return {
        "embedding": params["embedding"].astype(jnp.float32),
        "w_ih_t": w_ih_t,
        "w_hh_t": w_hh_t,
        "b_gates": b_gates,
        "w_out_pad": w_out_pad,
        "b_out_pad": b_out_pad,
    }


@functools.partial(jax.jit, static_argnums=(5,))
def decoder_decode(ids_seq, hidden, cell, encoder_output, prepped, vocab):
    """Fused T-step teacher-forced decode: one pallas_call, grid over decode steps,
    weights VMEM-resident, h/c carried in VMEM scratch, final state aliased in-place."""
    T, B = ids_seq.shape
    L, _, H = hidden.shape
    S = encoder_output.shape[1]
    Vtab, E = prepped["embedding"].shape
    G = prepped["b_gates"].shape[1]               # 4H
    Vp = prepped["w_out_pad"].shape[1]

    enc_bf = encoder_output.astype(jnp.bfloat16)                              # [B, S, H]
    enc_t_bf = jnp.transpose(encoder_output, (0, 2, 1)).astype(jnp.bfloat16)  # [B, H, S], once

    def full(shape):          # whole-array block, constant index -> loaded once, resident
        return pl.BlockSpec(shape, lambda *_: (0,) * len(shape))

    grid_spec = pltpu.PrefetchScalarGridSpec(
        num_scalar_prefetch=1,                    # ids_seq -> SMEM, visible in index_maps
        grid=(T,),
        in_specs=[
            full((L, B, H)),                      # hidden  (aliased -> h_out)
            full((L, B, H)),                      # cell    (aliased -> c_out)
            full((Vtab, E)),                      # embedding table
            full((B, S, H)),                      # encoder output (bf16)
            full((B, H, S)),                      # encoder output, pre-transposed (bf16)
            full((L, E, G)),                      # w_ih^T (bf16)
            full((L, H, G)),                      # w_hh^T (bf16)
            full((L, G)),                         # b_ih + b_hh (f32)
            full((H, Vp)),                        # output projection (bf16, lane padded)
            full((1, Vp)),                        # output bias (f32)
        ],
        out_specs=(
            pl.BlockSpec((None, B, Vp), lambda t, ids: (t, 0, 0)),   # per-step logits
            full((L, B, H)),                      # final hidden
            full((L, B, H)),                      # final cell
        ),
        scratch_shapes=[pltpu.VMEM((L, B, H), jnp.float32),          # carried h state
                        pltpu.VMEM((L, B, H), jnp.float32)],         # carried c state
    )

    preds_pad, h_fin, c_fin = pl.pallas_call(
        decoder_decode_kernel,
        grid_spec=grid_spec,
        out_shape=(
            jax.ShapeDtypeStruct((T, B, Vp), jnp.float32),
            jax.ShapeDtypeStruct((L, B, H), jnp.float32),
            jax.ShapeDtypeStruct((L, B, H), jnp.float32),
        ),
        # input indices count the scalar-prefetch ids as 0: 1 = hidden, 2 = cell
        input_output_aliases={1: 1, 2: 2},
        compiler_params=pltpu.CompilerParams(
            dimension_semantics=("arbitrary",)),  # sequential: state carried across steps
    )(ids_seq, hidden, cell, prepped["embedding"], enc_bf, enc_t_bf,
      prepped["w_ih_t"], prepped["w_hh_t"], prepped["b_gates"],
      prepped["w_out_pad"], prepped["b_out_pad"])

    return preds_pad[:, :, :vocab], h_fin, c_fin


def decoder_forward(input_ids, hidden, cell, encoder_output, prepped, vocab):
    """Single decode step; mirrors PyTorch Decoder.forward (eval mode)."""
    preds, h_new, c_new = decoder_decode(input_ids[None, :], hidden, cell,
                                         encoder_output, prepped, vocab)
    return preds[0], h_new, c_new


# ----------------------------- pure-JAX f32 reference -----------------------------

def decoder_reference_step(input_ids, hidden, cell, encoder_output, params):
    emb = params["embedding"][input_ids]                          # [B, E]
    L, B, H = hidden.shape
    hp = jnp.transpose(hidden, (1, 0, 2))                         # [B, L, H]
    scores = jnp.einsum("blh,bsh->bls", hp, encoder_output)       # [B, L, S]
    attw = jax.nn.softmax(scores, axis=2)
    attn = jnp.einsum("bls,bsh->blh", attw, encoder_output)       # [B, L, H]
    h_upd = jnp.tanh(jnp.transpose(attn, (1, 0, 2)))              # [L, B, H]

    x = emb
    h_out, c_out = [], []
    for l in range(L):
        gates = (x @ params["w_ih"][l].T + params["b_ih"][l]
                 + h_upd[l] @ params["w_hh"][l].T + params["b_hh"][l])
        i_g = jax.nn.sigmoid(gates[:, 0 * H:1 * H])
        f_g = jax.nn.sigmoid(gates[:, 1 * H:2 * H])
        g_g = jnp.tanh(gates[:, 2 * H:3 * H])
        o_g = jax.nn.sigmoid(gates[:, 3 * H:4 * H])
        c_new = f_g * cell[l] + i_g * g_g
        h_new = o_g * jnp.tanh(c_new)
        h_out.append(h_new)
        c_out.append(c_new)
        x = h_new
    pred = x @ params["w_out"].T + params["b_out"]
    return pred, jnp.stack(h_out), jnp.stack(c_out)


def decoder_reference_decode(ids_seq, hidden, cell, encoder_output, params):
    preds = []
    h, c = hidden, cell
    for t in range(ids_seq.shape[0]):
        p, h, c = decoder_reference_step(ids_seq[t], h, c, encoder_output, params)
        preds.append(p)
    return jnp.stack(preds, axis=0), h, c


def init_params(key, vocab, emb_dim, hid_dim, n_layers):
    assert emb_dim == hid_dim, "per-layer LSTM weights are stacked; set emb_dim == hid_dim"
    ks = jax.random.split(key, 8)
    bound = 1.0 / math.sqrt(hid_dim)
    u = lambda k, shape: jax.random.uniform(k, shape, jnp.float32, -bound, bound)
    return {
        "embedding": jax.random.normal(ks[0], (vocab, emb_dim), jnp.float32) * 0.1,
        "w_ih": u(ks[1], (n_layers, 4 * hid_dim, emb_dim)),
        "w_hh": u(ks[2], (n_layers, 4 * hid_dim, hid_dim)),
        "b_ih": u(ks[3], (n_layers, 4 * hid_dim)),
        "b_hh": u(ks[4], (n_layers, 4 * hid_dim)),
        "w_out": u(ks[5], (vocab, hid_dim)),
        "b_out": u(ks[6], (vocab,)),
    }


if __name__ == "__main__":
    V, E, H, L = 64, 32, 32, 2     # output_dim(vocab), emb_dim, hid_dim, n_layers
    B, S, T = 2, 8, 4              # batch, src_len, fused decode steps

    key = jax.random.PRNGKey(0)
    kp, k1, k2, k3, k4 = jax.random.split(key, 5)

    params = init_params(kp, V, E, H, L)
    ids_seq = jax.random.randint(k1, (T, B), 0, V)                  # teacher-forced token ids
    hidden = jax.random.normal(k2, (L, B, H), jnp.float32)
    cell = jax.random.normal(k3, (L, B, H), jnp.float32)
    encoder_output = jax.random.normal(k4, (B, S, H), jnp.float32)

    prepped = prepare_decoder_params(params)         # one-time weight prep

    # Single step (module-equivalent Decoder.forward).
    pred1, h1, c1 = jax.block_until_ready(
        decoder_forward(ids_seq[0], hidden, cell, encoder_output, prepped, V))

    # Fused T-step decode (teacher forcing), one pallas_call for all steps.
    preds, h_fin, c_fin = jax.block_until_ready(
        decoder_decode(ids_seq, hidden, cell, encoder_output, prepped, V))

    pred1_r, h1_r, c1_r = decoder_reference_step(ids_seq[0], hidden, cell, encoder_output, params)
    preds_r, h_r, c_r = decoder_reference_decode(ids_seq, hidden, cell, encoder_output, params)

    assert pred1.shape == (B, V) and preds.shape == (T, B, V)
    assert h_fin.shape == (L, B, H) and c_fin.shape == (L, B, H)

    # Tolerances loosened (bf16 MXU operands + approx reciprocal) as anticipated in review.
    tol = dict(rtol=5e-2, atol=5e-2)
    assert jnp.allclose(pred1, pred1_r, **tol)
    assert jnp.allclose(h1, h1_r, **tol) and jnp.allclose(c1, c1_r, **tol)
    assert jnp.allclose(preds, preds_r, **tol)
    assert jnp.allclose(h_fin, h_r, **tol) and jnp.allclose(c_fin, c_r, **tol)

    print("KERNEL_OK")
</pallas_src>

<mosaic_0001>
module attributes {stable_mosaic.version = 11 : i64} {
  func.func @decoder_decode_kernel(%arg0: i32, %arg1: memref<1x2xi32, #tpu.memory_space<smem>>, %arg2: memref<2x2x32xf32, #tpu.memory_space<vmem>>, %arg3: memref<2x2x32xf32, #tpu.memory_space<vmem>>, %arg4: memref<64x32xf32, #tpu.memory_space<vmem>>, %arg5: memref<2x8x32xbf16, #tpu.memory_space<vmem>>, %arg6: memref<2x32x8xbf16, #tpu.memory_space<vmem>>, %arg7: memref<2x32x128xbf16, #tpu.memory_space<vmem>>, %arg8: memref<2x32x128xbf16, #tpu.memory_space<vmem>>, %arg9: memref<2x128xf32, #tpu.memory_space<vmem>>, %arg10: memref<32x128xbf16, #tpu.memory_space<vmem>>, %arg11: memref<1x128xf32, #tpu.memory_space<vmem>>, %arg12: memref<1x2x128xf32, #tpu.memory_space<vmem>>, %arg13: memref<2x2x32xf32, #tpu.memory_space<vmem>>, %arg14: memref<2x2x32xf32, #tpu.memory_space<vmem>>, %arg15: memref<2x2x32xf32, #tpu.memory_space<vmem>>, %arg16: memref<2x2x32xf32, #tpu.memory_space<vmem>>) attributes {dimension_semantics = [#tpu.dimension_semantics<arbitrary>], iteration_bounds = array<i64: 1>, scalar_prefetch = 1 : i64, scratch_operands = 2 : i64, tpu.core_type = #tpu.core_type<tc>, window_params = [{pipeline_mode = #tpu.pipeline_mode<synchronous>, transform_indices = @transform_0, window_bounds = array<i64: 2, 2, 32>}, {pipeline_mode = #tpu.pipeline_mode<synchronous>, transform_indices = @transform_1, window_bounds = array<i64: 2, 2, 32>}, {pipeline_mode = #tpu.pipeline_mode<synchronous>, transform_indices = @transform_2, window_bounds = array<i64: 64, 32>}, {pipeline_mode = #tpu.pipeline_mode<synchronous>, transform_indices = @transform_3, window_bounds = array<i64: 2, 8, 32>}, {pipeline_mode = #tpu.pipeline_mode<synchronous>, transform_indices = @transform_4, window_bounds = array<i64: 2, 32, 8>}, {pipeline_mode = #tpu.pipeline_mode<synchronous>, transform_indices = @transform_5, window_bounds = array<i64: 2, 32, 128>}, {pipeline_mode = #tpu.pipeline_mode<synchronous>, transform_indices = @transform_6, window_bounds = array<i64: 2, 32, 128>}, {pipeline_mode = #tpu.pipeline_mode<synchronous>, transform_indices = @transform_7, window_bounds = array<i64: 2, 128>}, {pipeline_mode = #tpu.pipeline_mode<synchronous>, transform_indices = @transform_8, window_bounds = array<i64: 32, 128>}, {pipeline_mode = #tpu.pipeline_mode<synchronous>, transform_indices = @transform_9, window_bounds = array<i64: 1, 128>}, {transform_indices = @transform_10, window_bounds = array<i64: 1, 2, 128>}, {pipeline_mode = #tpu.pipeline_mode<synchronous>, transform_indices = @transform_11, window_bounds = array<i64: 2, 2, 32>}, {pipeline_mode = #tpu.pipeline_mode<synchronous>, transform_indices = @transform_12, window_bounds = array<i64: 2, 2, 32>}]} {
    %c0_i32 = arith.constant 0 : i32
    %0 = arith.cmpi eq, %arg0, %c0_i32 : i32
    %1 = arith.extui %0 : i1 to i32
    %c0_i32_0 = arith.constant 0 : i32
    %2 = arith.cmpi ne, %1, %c0_i32_0 : i32
    scf.if %2 {
      %c0_68 = arith.constant 0 : index
      %c0_69 = arith.constant 0 : index
      %c0_70 = arith.constant 0 : index
      %135 = vector.load %arg2[%c0_68, %c0_69, %c0_70] : memref<2x2x32xf32, #tpu.memory_space<vmem>>, vector<2x2x32xf32>
      %c0_71 = arith.constant 0 : index
      %c0_72 = arith.constant 0 : index
      %c0_73 = arith.constant 0 : index
      %136 = vector.load %arg15[%c0_71, %c0_72, %c0_73] : memref<2x2x32xf32, #tpu.memory_space<vmem>>, vector<2x2x32xf32>
      tpu.vector_store %arg15[%c0_71, %c0_72, %c0_73], %135 {strides = array<i32>} : memref<2x2x32xf32, #tpu.memory_space<vmem>>, vector<2x2x32xf32>,
      %c0_74 = arith.constant 0 : index
      %c0_75 = arith.constant 0 : index
      %c0_76 = arith.constant 0 : index
      %137 = vector.load %arg3[%c0_74, %c0_75, %c0_76] : memref<2x2x32xf32, #tpu.memory_space<vmem>>, vector<2x2x32xf32>
      %c0_77 = arith.constant 0 : index
      %c0_78 = arith.constant 0 : index
      %c0_79 = arith.constant 0 : index
      %138 = vector.load %arg16[%c0_77, %c0_78, %c0_79] : memref<2x2x32xf32, #tpu.memory_space<vmem>>, vector<2x2x32xf32>
      tpu.vector_store %arg16[%c0_77, %c0_78, %c0_79], %137 {strides = array<i32>} : memref<2x2x32xf32, #tpu.memory_space<vmem>>, vector<2x2x32xf32>,
    } else {
    }
    %3 = arith.index_cast %arg0 : i32 to index
    %c0 = arith.constant 0 : index
    %4 = memref.load %arg1[%3, %c0] : memref<1x2xi32, #tpu.memory_space<smem>>
    %5 = arith.index_cast %4 : i32 to index
    %c0_1 = arith.constant 0 : index
    %6 = vector.load %arg4[%5, %c0_1] : memref<64x32xf32, #tpu.memory_space<vmem>>, vector<1x32xf32>
    %7 = arith.index_cast %arg0 : i32 to index
    %c1 = arith.constant 1 : index
    %8 = memref.load %arg1[%7, %c1] : memref<1x2xi32, #tpu.memory_space<smem>>
    %9 = arith.index_cast %8 : i32 to index
    %c0_2 = arith.constant 0 : index
    %10 = vector.load %arg4[%9, %c0_2] : memref<64x32xf32, #tpu.memory_space<vmem>>, vector<1x32xf32>
    %11 = tpu.concatenate %6, %10 in 0 : vector<1x32xf32>, vector<1x32xf32> -> vector<2x32xf32>
    %12 = arith.truncf %11 : vector<2x32xf32> to vector<2x32xbf16>
    %c0_3 = arith.constant 0 : index
    %c0_4 = arith.constant 0 : index
    %c0_5 = arith.constant 0 : index
    %13 = vector.load %arg15[%c0_3, %c0_4, %c0_5] : memref<2x2x32xf32, #tpu.memory_space<vmem>>, vector<1x2x32xf32>
    %14 = vector.shape_cast %13 : vector<1x2x32xf32> to vector<2x32xf32>
    %c1_6 = arith.constant 1 : index
    %c0_7 = arith.constant 0 : index
    %c0_8 = arith.constant 0 : index
    %15 = vector.load %arg15[%c1_6, %c0_7, %c0_8] : memref<2x2x32xf32, #tpu.memory_space<vmem>>, vector<1x2x32xf32>
    %16 = vector.shape_cast %15 : vector<1x2x32xf32> to vector<2x32xf32>
    %17 = vector.shape_cast %14 : vector<2x32xf32> to vector<2x1x32xf32>
    %18 = vector.shape_cast %16 : vector<2x32xf32> to vector<2x1x32xf32>
    %19 = tpu.concatenate %17, %18 in 1 : vector<2x1x32xf32>, vector<2x1x32xf32> -> vector<2x2x32xf32>
    %20 = arith.truncf %19 : vector<2x2x32xf32> to vector<2x2x32xbf16>
    %c0_9 = arith.constant 0 : index
    %c0_10 = arith.constant 0 : index
    %c0_11 = arith.constant 0 : index
    %21 = vector.load %arg6[%c0_9, %c0_10, %c0_11] : memref<2x32x8xbf16, #tpu.memory_space<vmem>>, vector<2x32x8xbf16>
    "tpu.trace_start"() <{level = 10 : i32, message = "blh,bhs->bls"}> : () -> ()
    %cst = arith.constant dense<0.000000e+00> : vector<2x2x8xf32>
    %22 = tpu.matmul %20, %21, %cst {dimension_numbers = #tpu.dot_dimension_numbers<[2], [1], [1], [2], [0, 0, 0, 1, 1, 2], [0], [0]>} : vector<2x2x32xbf16>, vector<2x32x8xbf16>, vector<2x2x8xf32> -> vector<2x2x8xf32>
    "tpu.trace_stop"() : () -> ()
    %cst_12 = arith.constant dense<0xFF800000> : vector<2x2xf32>
    %23 = vector.multi_reduction <maximumf>, %22, %cst_12 [2] : vector<2x2x8xf32> to vector<2x2xf32>
    %24 = vector.shape_cast %23 : vector<2x2xf32> to vector<2x2x1xf32>
    %25 = vector.broadcast %24 : vector<2x2x1xf32> to vector<2x2x8xf32>
    %26 = arith.subf %22, %25 : vector<2x2x8xf32>
    %27 = math.exp %26 : vector<2x2x8xf32>
    %cst_13 = arith.constant dense<0.000000e+00> : vector<2x2xf32>
    %28 = vector.multi_reduction <add>, %27, %cst_13 [2] : vector<2x2x8xf32> to vector<2x2xf32>
    %29 = vector.shape_cast %28 : vector<2x2xf32> to vector<2x2x1xf32>
    %30 = tpu.reciprocal %29 {approx = true} : vector<2x2x1xf32> -> vector<2x2x1xf32>
    %31 = vector.broadcast %30 : vector<2x2x1xf32> to vector<2x2x8xf32>
    %32 = arith.mulf %27, %31 : vector<2x2x8xf32>
    %33 = arith.truncf %32 : vector<2x2x8xf32> to vector<2x2x8xbf16>
    %c0_14 = arith.constant 0 : index
    %c0_15 = arith.constant 0 : index
    %c0_16 = arith.constant 0 : index
    %34 = vector.load %arg5[%c0_14, %c0_15, %c0_16] : memref<2x8x32xbf16, #tpu.memory_space<vmem>>, vector<2x8x32xbf16>
    "tpu.trace_start"() <{level = 10 : i32, message = "bls,bsh->blh"}> : () -> ()
    %cst_17 = arith.constant dense<0.000000e+00> : vector<2x2x32xf32>
    %35 = tpu.matmul %33, %34, %cst_17 {dimension_numbers = #tpu.dot_dimension_numbers<[2], [1], [1], [2], [0, 0, 0, 1, 1, 2], [0], [0]>} : vector<2x2x8xbf16>, vector<2x8x32xbf16>, vector<2x2x32xf32> -> vector<2x2x32xf32>
    "tpu.trace_stop"() : () -> ()
    %36 = math.tanh %35 : vector<2x2x32xf32>
    %37 = vector.extract_strided_slice %36 {offsets = [0, 0, 0], sizes = [2, 1, 32], strides = [1, 1, 1]} : vector<2x2x32xf32> to vector<2x1x32xf32>
    %38 = vector.shape_cast %37 : vector<2x1x32xf32> to vector<2x32xf32>
    %39 = arith.truncf %38 : vector<2x32xf32> to vector<2x32xbf16>
    %c0_18 = arith.constant 0 : index
    %c0_19 = arith.constant 0 : index
    %c0_20 = arith.constant 0 : index
    %40 = vector.load %arg8[%c0_18, %c0_19, %c0_20] : memref<2x32x128xbf16, #tpu.memory_space<vmem>>, vector<1x32x128xbf16>
    %41 = vector.shape_cast %40 : vector<1x32x128xbf16> to vector<32x128xbf16>
    %cst_21 = arith.constant dense<0.000000e+00> : vector<2x128xf32>
    %42 = tpu.matmul %39, %41, %cst_21 {dimension_numbers = #tpu.dot_dimension_numbers<[1], [0], [0], [1], [0, 0, 1, 1], [], []>} : vector<2x32xbf16>, vector<32x128xbf16>, vector<2x128xf32> -> vector<2x128xf32>
    %43 = vector.extract_strided_slice %36 {offsets = [0, 1, 0], sizes = [2, 1, 32], strides = [1, 1, 1]} : vector<2x2x32xf32> to vector<2x1x32xf32>
    %44 = vector.shape_cast %43 : vector<2x1x32xf32> to vector<2x32xf32>
    %45 = arith.truncf %44 : vector<2x32xf32> to vector<2x32xbf16>
    %c1_22 = arith.constant 1 : index
    %c0_23 = arith.constant 0 : index
    %c0_24 = arith.constant 0 : index
    %46 = vector.load %arg8[%c1_22, %c0_23, %c0_24] : memref<2x32x128xbf16, #tpu.memory_space<vmem>>, vector<1x32x128xbf16>
    %47 = vector.shape_cast %46 : vector<1x32x128xbf16> to vector<32x128xbf16>
    %cst_25 = arith.constant dense<0.000000e+00> : vector<2x128xf32>
    %48 = tpu.matmul %45, %47, %cst_25 {dimension_numbers = #tpu.dot_dimension_numbers<[1], [0], [0], [1], [0, 0, 1, 1], [], []>} : vector<2x32xbf16>, vector<32x128xbf16>, vector<2x128xf32> -> vector<2x128xf32>
    %c0_26 = arith.constant 0 : index
    %c0_27 = arith.constant 0 : index
    %49 = vector.load %arg9[%c0_26, %c0_27] : memref<2x128xf32, #tpu.memory_space<vmem>>, vector<2x128xf32>
    %c0_28 = arith.constant 0 : index
    %c0_29 = arith.constant 0 : index
    %c0_30 = arith.constant 0 : index
    %50 = vector.load %arg7[%c0_28, %c0_29, %c0_30] : memref<2x32x128xbf16, #tpu.memory_space<vmem>>, vector<1x32x128xbf16>
    %51 = vector.shape_cast %50 : vector<1x32x128xbf16> to vector<32x128xbf16>
    %cst_31 = arith.constant dense<0.000000e+00> : vector<2x128xf32>
    %52 = tpu.matmul %12, %51, %cst_31 {dimension_numbers = #tpu.dot_dimension_numbers<[1], [0], [0], [1], [0, 0, 1, 1], [], []>} : vector<2x32xbf16>, vector<32x128xbf16>, vector<2x128xf32> -> vector<2x128xf32>
    %53 = arith.addf %52, %42 : vector<2x128xf32>
    %54 = vector.extract_strided_slice %49 {offsets = [0, 0], sizes = [1, 128], strides = [1, 1]} : vector<2x128xf32> to vector<1x128xf32>
    %55 = vector.broadcast %54 : vector<1x128xf32> to vector<2x128xf32>
    %56 = arith.addf %53, %55 : vector<2x128xf32>
    %57 = vector.extract_strided_slice %56 {offsets = [0, 0], sizes = [2, 64], strides = [1, 1]} : vector<2x128xf32> to vector<2x64xf32>
    %58 = arith.negf %57 : vector<2x64xf32>
    %59 = math.exp %58 : vector<2x64xf32>
    %cst_32 = arith.constant 1.000000e+00 : f32
    %60 = vector.broadcast %cst_32 : f32 to vector<2x64xf32>
    %61 = arith.addf %60, %59 : vector<2x64xf32>
    %62 = arith.divf %60, %61 : vector<2x64xf32>
    %63 = vector.extract_strided_slice %62 {offsets = [0, 0], sizes = [2, 32], strides = [1, 1]} : vector<2x64xf32> to vector<2x32xf32>
    %64 = vector.extract_strided_slice %62 {offsets = [0, 32], sizes = [2, 32], strides = [1, 1]} : vector<2x64xf32> to vector<2x32xf32>
    %65 = vector.extract_strided_slice %56 {offsets = [0, 64], sizes = [2, 32], strides = [1, 1]} : vector<2x128xf32> to vector<2x32xf32>
    %66 = math.tanh %65 : vector<2x32xf32>
    %67 = vector.extract_strided_slice %56 {offsets = [0, 96], sizes = [2, 32], strides = [1, 1]} : vector<2x128xf32> to vector<2x32xf32>
    %68 = arith.negf %67 : vector<2x32xf32>
    %69 = math.exp %68 : vector<2x32xf32>
    %cst_33 = arith.constant 1.000000e+00 : f32
    %70 = vector.broadcast %cst_33 : f32 to vector<2x32xf32>
    %71 = arith.addf %70, %69 : vector<2x32xf32>
    %72 = arith.divf %70, %71 : vector<2x32xf32>
    %c0_34 = arith.constant 0 : index
    %c0_35 = arith.constant 0 : index
    %c0_36 = arith.constant 0 : index
    %73 = vector.load %arg16[%c0_34, %c0_35, %c0_36] : memref<2x2x32xf32, #tpu.memory_space<vmem>>, vector<1x2x32xf32>
    %74 = vector.shape_cast %73 : vector<1x2x32xf32> to vector<2x32xf32>
    %75 = arith.mulf %64, %74 : vector<2x32xf32>
    %76 = arith.mulf %63, %66 : vector<2x32xf32>
    %77 = arith.addf %75, %76 : vector<2x32xf32>
    %78 = math.tanh %77 : vector<2x32xf32>
    %79 = arith.mulf %72, %78 : vector<2x32xf32>
    %c0_37 = arith.constant 0 : index
    %c0_38 = arith.constant 0 : index
    %c0_39 = arith.constant 0 : index
    %80 = vector.load %arg15[%c0_37, %c0_38, %c0_39] : memref<2x2x32xf32, #tpu.memory_space<vmem>>, vector<1x2x32xf32>
    %81 = vector.shape_cast %80 : vector<1x2x32xf32> to vector<2x32xf32>
    %82 = vector.shape_cast %79 : vector<2x32xf32> to vector<1x2x32xf32>
    tpu.vector_store %arg15[%c0_37, %c0_38, %c0_39], %82 {strides = array<i32>} : memref<2x2x32xf32, #tpu.memory_space<vmem>>, vector<1x2x32xf32>,
    %c0_40 = arith.constant 0 : index
    %c0_41 = arith.constant 0 : index
    %c0_42 = arith.constant 0 : index
    %83 = vector.load %arg16[%c0_40, %c0_41, %c0_42] : memref<2x2x32xf32, #tpu.memory_space<vmem>>, vector<1x2x32xf32>
    %84 = vector.shape_cast %83 : vector<1x2x32xf32> to vector<2x32xf32>
    %85 = vector.shape_cast %77 : vector<2x32xf32> to vector<1x2x32xf32>
    tpu.vector_store %arg16[%c0_40, %c0_41, %c0_42], %85 {strides = array<i32>} : memref<2x2x32xf32, #tpu.memory_space<vmem>>, vector<1x2x32xf32>,
    %86 = arith.truncf %79 : vector<2x32xf32> to vector<2x32xbf16>
    %c1_43 = arith.constant 1 : index
    %c0_44 = arith.constant 0 : index
    %c0_45 = arith.constant 0 : index
    %87 = vector.load %arg7[%c1_43, %c0_44, %c0_45] : memref<2x32x128xbf16, #tpu.memory_space<vmem>>, vector<1x32x128xbf16>
    %88 = vector.shape_cast %87 : vector<1x32x128xbf16> to vector<32x128xbf16>
    %cst_46 = arith.constant dense<0.000000e+00> : vector<2x128xf32>
    %89 = tpu.matmul %86, %88, %cst_46 {dimension_numbers = #tpu.dot_dimension_numbers<[1], [0], [0], [1], [0, 0, 1, 1], [], []>} : vector<2x32xbf16>, vector<32x128xbf16>, vector<2x128xf32> -> vector<2x128xf32>
    %90 = arith.addf %89, %48 : vector<2x128xf32>
    %91 = vector.extract_strided_slice %49 {offsets = [1, 0], sizes = [1, 128], strides = [1, 1]} : vector<2x128xf32> to vector<1x128xf32>
    %92 = vector.broadcast %91 : vector<1x128xf32> to vector<2x128xf32>
    %93 = arith.addf %90, %92 : vector<2x128xf32>
    %94 = vector.extract_strided_slice %93 {offsets = [0, 0], sizes = [2, 64], strides = [1, 1]} : vector<2x128xf32> to vector<2x64xf32>
    %95 = arith.negf %94 : vector<2x64xf32>
    %96 = math.exp %95 : vector<2x64xf32>
    %cst_47 = arith.constant 1.000000e+00 : f32
    %97 = vector.broadcast %cst_47 : f32 to vector<2x64xf32>
    %98 = arith.addf %97, %96 : vector<2x64xf32>
    %99 = arith.divf %97, %98 : vector<2x64xf32>
    %100 = vector.extract_strided_slice %99 {offsets = [0, 0], sizes = [2, 32], strides = [1, 1]} : vector<2x64xf32> to vector<2x32xf32>
    %101 = vector.extract_strided_slice %99 {offsets = [0, 32], sizes = [2, 32], strides = [1, 1]} : vector<2x64xf32> to vector<2x32xf32>
    %102 = vector.extract_strided_slice %93 {offsets = [0, 64], sizes = [2, 32], strides = [1, 1]} : vector<2x128xf32> to vector<2x32xf32>
    %103 = math.tanh %102 : vector<2x32xf32>
    %104 = vector.extract_strided_slice %93 {offsets = [0, 96], sizes = [2, 32], strides = [1, 1]} : vector<2x128xf32> to vector<2x32xf32>
    %105 = arith.negf %104 : vector<2x32xf32>
    %106 = math.exp %105 : vector<2x32xf32>
    %cst_48 = arith.constant 1.000000e+00 : f32
    %107 = vector.broadcast %cst_48 : f32 to vector<2x32xf32>
    %108 = arith.addf %107, %106 : vector<2x32xf32>
    %109 = arith.divf %107, %108 : vector<2x32xf32>
    %c1_49 = arith.constant 1 : index
    %c0_50 = arith.constant 0 : index
    %c0_51 = arith.constant 0 : index
    %110 = vector.load %arg16[%c1_49, %c0_50, %c0_51] : memref<2x2x32xf32, #tpu.memory_space<vmem>>, vector<1x2x32xf32>
    %111 = vector.shape_cast %110 : vector<1x2x32xf32> to vector<2x32xf32>
    %112 = arith.mulf %101, %111 : vector<2x32xf32>
    %113 = arith.mulf %100, %103 : vector<2x32xf32>
    %114 = arith.addf %112, %113 : vector<2x32xf32>
    %115 = math.tanh %114 : vector<2x32xf32>
    %116 = arith.mulf %109, %115 : vector<2x32xf32>
    %c1_52 = arith.constant 1 : index
    %c0_53 = arith.constant 0 : index
    %c0_54 = arith.constant 0 : index
    %117 = vector.load %arg15[%c1_52, %c0_53, %c0_54] : memref<2x2x32xf32, #tpu.memory_space<vmem>>, vector<1x2x32xf32>
    %118 = vector.shape_cast %117 : vector<1x2x32xf32> to vector<2x32xf32>
    %119 = vector.shape_cast %116 : vector<2x32xf32> to vector<1x2x32xf32>
    tpu.vector_store %arg15[%c1_52, %c0_53, %c0_54], %119 {strides = array<i32>} : memref<2x2x32xf32, #tpu.memory_space<vmem>>, vector<1x2x32xf32>,
    %c1_55 = arith.constant 1 : index
    %c0_56 = arith.constant 0 : index
    %c0_57 = arith.constant 0 : index
    %120 = vector.load %arg16[%c1_55, %c0_56, %c0_57] : memref<2x2x32xf32, #tpu.memory_space<vmem>>, vector<1x2x32xf32>
    %121 = vector.shape_cast %120 : vector<1x2x32xf32> to vector<2x32xf32>
    %122 = vector.shape_cast %114 : vector<2x32xf32> to vector<1x2x32xf32>
    tpu.vector_store %arg16[%c1_55, %c0_56, %c0_57], %122 {strides = array<i32>} : memref<2x2x32xf32, #tpu.memory_space<vmem>>, vector<1x2x32xf32>,
    %123 = arith.truncf %116 : vector<2x32xf32> to vector<2x32xbf16>
    %c0_58 = arith.constant 0 : index
    %c0_59 = arith.constant 0 : index
    %124 = vector.load %arg10[%c0_58, %c0_59] : memref<32x128xbf16, #tpu.memory_space<vmem>>, vector<32x128xbf16>
    %cst_60 = arith.constant dense<0.000000e+00> : vector<2x128xf32>
    %125 = tpu.matmul %123, %124, %cst_60 {dimension_numbers = #tpu.dot_dimension_numbers<[1], [0], [0], [1], [0, 0, 1, 1], [], []>} : vector<2x32xbf16>, vector<32x128xbf16>, vector<2x128xf32> -> vector<2x128xf32>
    %c0_61 = arith.constant 0 : index
    %c0_62 = arith.constant 0 : index
    %126 = vector.load %arg11[%c0_61, %c0_62] : memref<1x128xf32, #tpu.memory_space<vmem>>, vector<1x128xf32>
    %127 = vector.broadcast %126 : vector<1x128xf32> to vector<2x128xf32>
    %128 = arith.addf %125, %127 : vector<2x128xf32>
    %c0_63 = arith.constant 0 : index
    %c0_64 = arith.constant 0 : index
    %c0_65 = arith.constant 0 : index
    %129 = vector.load %arg12[%c0_63, %c0_64, %c0_65] : memref<1x2x128xf32, #tpu.memory_space<vmem>>, vector<1x2x128xf32>
    %130 = vector.shape_cast %129 : vector<1x2x128xf32> to vector<2x128xf32>
    %131 = vector.shape_cast %128 : vector<2x128xf32> to vector<1x2x128xf32>
    tpu.vector_store %arg12[%c0_63, %c0_64, %c0_65], %131 {strides = array<i32>} : memref<1x2x128xf32, #tpu.memory_space<vmem>>, vector<1x2x128xf32>,
    %c0_i32_66 = arith.constant 0 : i32
    %132 = arith.cmpi eq, %arg0, %c0_i32_66 : i32
    %133 = arith.extui %132 : i1 to i32
    %c0_i32_67 = arith.constant 0 : i32
    %134 = arith.cmpi ne, %133, %c0_i32_67 : i32
    scf.if %134 {
      %c0_68 = arith.constant 0 : index
      %c0_69 = arith.constant 0 : index
      %c0_70 = arith.constant 0 : index
      %135 = vector.load %arg15[%c0_68, %c0_69, %c0_70] : memref<2x2x32xf32, #tpu.memory_space<vmem>>, vector<2x2x32xf32>
      %c0_71 = arith.constant 0 : index
      %c0_72 = arith.constant 0 : index
      %c0_73 = arith.constant 0 : index
      %136 = vector.load %arg13[%c0_71, %c0_72, %c0_73] : memref<2x2x32xf32, #tpu.memory_space<vmem>>, vector<2x2x32xf32>
      tpu.vector_store %arg13[%c0_71, %c0_72, %c0_73], %135 {strides = array<i32>} : memref<2x2x32xf32, #tpu.memory_space<vmem>>, vector<2x2x32xf32>,
      %c0_74 = arith.constant 0 : index
      %c0_75 = arith.constant 0 : index
      %c0_76 = arith.constant 0 : index
      %137 = vector.load %arg16[%c0_74, %c0_75, %c0_76] : memref<2x2x32xf32, #tpu.memory_space<vmem>>, vector<2x2x32xf32>
      %c0_77 = arith.constant 0 : index
      %c0_78 = arith.constant 0 : index
      %c0_79 = arith.constant 0 : index
      %138 = vector.load %arg14[%c0_77, %c0_78, %c0_79] : memref<2x2x32xf32, #tpu.memory_space<vmem>>, vector<2x2x32xf32>
      tpu.vector_store %arg14[%c0_77, %c0_78, %c0_79], %137 {strides = array<i32>} : memref<2x2x32xf32, #tpu.memory_space<vmem>>, vector<2x2x32xf32>,
    } else {
    }
    return
  }
  func.func @transform_0(%arg0: i32, %arg1: memref<1x2xi32, #tpu.memory_space<smem>>) -> (i32, i32, i32) {
    %c0_i32 = arith.constant 0 : i32
    %c0_i32_0 = arith.constant 0 : i32
    %c0_i32_1 = arith.constant 0 : i32
    %c0_i32_2 = arith.constant 0 : i32
    return %c0_i32, %c0_i32_0, %c0_i32_1 : i32, i32, i32
  }
  func.func @transform_1(%arg0: i32, %arg1: memref<1x2xi32, #tpu.memory_space<smem>>) -> (i32, i32, i32) {
    %c0_i32 = arith.constant 0 : i32
    %c0_i32_0 = arith.constant 0 : i32
    %c0_i32_1 = arith.constant 0 : i32
    %c0_i32_2 = arith.constant 0 : i32
    return %c0_i32, %c0_i32_0, %c0_i32_1 : i32, i32, i32
  }
  func.func @transform_2(%arg0: i32, %arg1: memref<1x2xi32, #tpu.memory_space<smem>>) -> (i32, i32) {
    %c0_i32 = arith.constant 0 : i32
    %c0_i32_0 = arith.constant 0 : i32
    %c0_i32_1 = arith.constant 0 : i32
    return %c0_i32, %c0_i32_0 : i32, i32
  }
  func.func @transform_3(%arg0: i32, %arg1: memref<1x2xi32, #tpu.memory_space<smem>>) -> (i32, i32, i32) {
    %c0_i32 = arith.constant 0 : i32
    %c0_i32_0 = arith.constant 0 : i32
    %c0_i32_1 = arith.constant 0 : i32
    %c0_i32_2 = arith.constant 0 : i32
    return %c0_i32, %c0_i32_0, %c0_i32_1 : i32, i32, i32
  }
  func.func @transform_4(%arg0: i32, %arg1: memref<1x2xi32, #tpu.memory_space<smem>>) -> (i32, i32, i32) {
    %c0_i32 = arith.constant 0 : i32
    %c0_i32_0 = arith.constant 0 : i32
    %c0_i32_1 = arith.constant 0 : i32
    %c0_i32_2 = arith.constant 0 : i32
    return %c0_i32, %c0_i32_0, %c0_i32_1 : i32, i32, i32
  }
  func.func @transform_5(%arg0: i32, %arg1: memref<1x2xi32, #tpu.memory_space<smem>>) -> (i32, i32, i32) {
    %c0_i32 = arith.constant 0 : i32
    %c0_i32_0 = arith.constant 0 : i32
    %c0_i32_1 = arith.constant 0 : i32
    %c0_i32_2 = arith.constant 0 : i32
    return %c0_i32, %c0_i32_0, %c0_i32_1 : i32, i32, i32
  }
  func.func @transform_6(%arg0: i32, %arg1: memref<1x2xi32, #tpu.memory_space<smem>>) -> (i32, i32, i32) {
    %c0_i32 = arith.constant 0 : i32
    %c0_i32_0 = arith.constant 0 : i32
    %c0_i32_1 = arith.constant 0 : i32
    %c0_i32_2 = arith.constant 0 : i32
    return %c0_i32, %c0_i32_0, %c0_i32_1 : i32, i32, i32
  }
  func.func @transform_7(%arg0: i32, %arg1: memref<1x2xi32, #tpu.memory_space<smem>>) -> (i32, i32) {
    %c0_i32 = arith.constant 0 : i32
    %c0_i32_0 = arith.constant 0 : i32
    %c0_i32_1 = arith.constant 0 : i32
    return %c0_i32, %c0_i32_0 : i32, i32
  }
  func.func @transform_8(%arg0: i32, %arg1: memref<1x2xi32, #tpu.memory_space<smem>>) -> (i32, i32) {
    %c0_i32 = arith.constant 0 : i32
    %c0_i32_0 = arith.constant 0 : i32
    %c0_i32_1 = arith.constant 0 : i32
    return %c0_i32, %c0_i32_0 : i32, i32
  }
  func.func @transform_9(%arg0: i32, %arg1: memref<1x2xi32, #tpu.memory_space<smem>>) -> (i32, i32) {
    %c0_i32 = arith.constant 0 : i32
    %c0_i32_0 = arith.constant 0 : i32
    %c0_i32_1 = arith.constant 0 : i32
    return %c0_i32, %c0_i32_0 : i32, i32
  }
  func.func @transform_10(%arg0: i32, %arg1: memref<1x2xi32, #tpu.memory_space<smem>>) -> (i32, i32, i32) {
    %c0_i32 = arith.constant 0 : i32
    %c0_i32_0 = arith.constant 0 : i32
    %c0_i32_1 = arith.constant 0 : i32
    return %arg0, %c0_i32, %c0_i32_0 : i32, i32, i32
  }
  func.func @transform_11(%arg0: i32, %arg1: memref<1x2xi32, #tpu.memory_space<smem>>) -> (i32, i32, i32) {
    %c0_i32 = arith.constant 0 : i32
    %c0_i32_0 = arith.constant 0 : i32
    %c0_i32_1 = arith.constant 0 : i32
    %c0_i32_2 = arith.constant 0 : i32
    return %c0_i32, %c0_i32_0, %c0_i32_1 : i32, i32, i32
  }
  func.func @transform_12(%arg0: i32, %arg1: memref<1x2xi32, #tpu.memory_space<smem>>) -> (i32, i32, i32) {
    %c0_i32 = arith.constant 0 : i32
    %c0_i32_0 = arith.constant 0 : i32
    %c0_i32_1 = arith.constant 0 : i32
    %c0_i32_2 = arith.constant 0 : i32
    return %c0_i32, %c0_i32_0, %c0_i32_1 : i32, i32, i32
  }
}

</mosaic_0001>

<bundles_post_ra>
// kernel: decoder_decode.1
= control target key start
LH: loop header
LB: loop body
LE: loop exit
PB: predicated region body
PF: predicated region fallthrough
CT: control target
= control target key end

     0   :  { %s726_s28 = smov [#allocation5]   ;;  %s929_s0 = inlined_call_operand.vmem [shape: s32[1,2], index: 0, kind: input, shape index: {}]   ;;  %s930_s1 = inlined_call_operand.vmem [shape: f32[2,2,32], index: 1, kind: input, shape index: {}, may-alias: {1,12}]   ;;  %s931_s2 = inlined_call_operand.vmem [shape: f32[2,2,32], index: 2, kind: input, shape index: {}, may-alias: {2,13}]   ;;  %s932_s3 = inlined_call_operand.vmem [shape: f32[64,32], index: 3, kind: input, shape index: {}]   ;;  %s933_s4 = inlined_call_operand.vmem [shape: bf16[2,8,32], index: 4, kind: input, shape index: {}]   ;;  %s934_s5 = inlined_call_operand.vmem [shape: bf16[2,32,8], index: 5, kind: input, shape index: {}]   ;;  %s935_s6 = inlined_call_operand.vmem [shape: bf16[2,32,128], index: 6, kind: input, shape index: {}]   ;;  %s936_s7 = inlined_call_operand.vmem [shape: bf16[2,32,128], index: 7, kind: input, shape index: {}]   ;;  %s937_s8 = inlined_call_operand.vmem [shape: f32[2,128], index: 8, kind: input, shape index: {}]   ;;  %s938_s9 = inlined_call_operand.vmem [shape: bf16[32,128], index: 9, kind: input, shape index: {}]   ;;  %s939_s10 = inlined_call_operand.vmem [shape: f32[1,128], index: 10, kind: input, shape index: {}]   ;;  %s940_s11 = inlined_call_operand.hbm [shape: f32[1,2,128], index: 11, kind: output, shape index: {0}]   ;;  %s941_s12 = inlined_call_operand.vmem [shape: f32[2,2,32], index: 12, kind: output, shape index: {1}, may-alias: {1,12}]   ;;  %s942_s13 = inlined_call_operand.vmem [shape: f32[2,2,32], index: 13, kind: output, shape index: {2}, may-alias: {2,13}]  }
   0x1   :  { %s20_s27 = sshll.u32 %s929_s0, 4  ;;  %s21_s27 = int_to_ptr.vmem [resolvable:$true] %s20_s27 }
   0x2   :  { %23 = dma.vmem_to_smem %s21_s27, 16, %s726_s28, [#allocation4] }
   0x3   :  { %722 = dma.done.wait [#allocation4], 16 }
   0x4   :  { %723 = vsyncadd [#allocation4], 4294967280 }
   0x5   :  { %26 = sfence }
   0x6   :  { %v639_v0 = vld [vmem:[%s934_s5 + $0x8] sm:$0xff]  ;;  %v641_v1 = vld [vmem:[%s934_s5 + $0x18] sm:$0xff]  ;;  %v638_v2 = vld [vmem:[%s934_s5] sm:$0xff]  ;;  %vm55_vm0 = vcmask 254976  }
   0x7   :  { %v640_v3 = vld [vmem:[%s934_s5 + $0x10] sm:$0xff]  ;;  %v53_v4 = vld [vmem:[%s930_s1] sm:$0x3]  ;;  %v54_v5 = vld [vmem:[%s930_s1 + $0x2] sm:$0x3]  ;;  %122 = vmatpush.bf16.msra.mxu0 %v639_v0  ;;  %150 = vmatpush.bf16.msra.mxu1 %v641_v1 }
   0x8   :  { %56 = vst.msk [vmem:[#allocation2] sm:$0x3] %vm55_vm0, %v53_v4 }
   0x9   :  { %27 = vsyncpa [#allocation7], 0  ;;  %57 = vst.msk [vmem:[#allocation2 + $0x2] sm:$0x3] %vm55_vm0, %v54_v5  ;;  %vm73_vm1 = vcmask 1040384   ;;  %vm112_vm2 = vcmask 261120  }
   0xa   :  { %vm157_vm3 = vcmask 58368   ;;  %v183_v32 = vld [vmem:[%s933_s4 + $0x4] sm:$0xf]  ;;  %vm188_vm4 = vcmask 1043456   ;;  %v182_v34 = vld [vmem:[%s933_s4] sm:$0xf] }
   0xb   :  { %123 = vmatpush.bf16.msra.mxu0 %v638_v2  ;;  %151 = vmatpush.bf16.msra.mxu1 %v640_v3  ;;  %v209_v33 = vsel %vm188_vm4, %v183_v32, 0  ;;  %v190_v35 = vsel %vm188_vm4, %v182_v34, 0  ;;  %vm184_vm5 = vcmask 64512   ;;  %s562_s25 = sld [smem:[#allocation5 + $0x1]]  ;;  %v643_v44 = vld [vmem:[%s936_s7 + $0x8] sm:$0xff]  ;;  %v645_v47 = vld [vmem:[%s936_s7 + $0x18] sm:$0xff] }
   0xc   :  { %218 = vmatpush.bf16.msra.mxu3 %v209_v33  ;;  %199 = vmatpush.bf16.msra.mxu2 %v190_v35  ;;  %s63_s26 = sld [smem:[#allocation5]]  ;;  %v647_v45 = vld [vmem:[%s935_s6 + $0x8] sm:$0xff]  ;;  %v646_v48 = vld [vmem:[%s935_s6] sm:$0xff]  ;;  %v644_v54 = vld [vmem:[%s936_s7 + $0x10] sm:$0xff]  ;;  %vm237_vm6 = vcmask 1041409   ;;  %s728_s27 = smov 32  }
   0xd   :  { %v642_v51 = vld [vmem:[%s936_s7] sm:$0xff]  ;;  %s730_s7 = smov [#allocation6]  }
   0xe   :  { %s541_s23 = sshll.u32 %s730_s7, 4  ;;  %s542_s23 = int_to_ptr.vmem [resolvable:$true] %s541_s23 }
   0xf   :  { %v76_v6 = vld [vmem:[#allocation2] sm:$0x3]  ;;  %330 = vmatpush.bf16.msrb.mxu0 %v647_v45 }
  0x10   :  { %v78_v7 = vld [vmem:[#allocation2 + $0x2] sm:$0x3]  ;;  %v80_v9 = vrot.slane %v76_v6, 1  ;;  %261 = vmatpush.bf16.msrb.mxu2 %v643_v44  ;;  %297 = vmatpush.bf16.msrb.mxu3 %v645_v47 }
  0x11   :  { %v84_v8 = vperm.slane %v78_v7, 0  ;;  %v83_v10 = vrot.slane %v78_v7, 1  ;;  %s68_s15 = scalar_lea.vmem %s932_s3, %s562_s25  ;;  %s543_s25 = sshll.u32 %s940_s11, 4  ;;  %s544_s25 = int_to_ptr.hbm [resolvable:$true] %s543_s25 }
  0x12   :  { %s64_s0 = scalar_lea.vmem %s932_s3, %s63_s26  ;;  %v69_v46 = vld [vmem:[%s68_s15] sm:$0x1]  ;;  %s727_s26 = smov 64  }
  0x13   :  { %v88_v11 = vsel %vm73_vm1, %v76_v6, %v84_v8  ;;  %v85_v12 = vperm.slane %v83_v10, 0  ;;  %v71_v49 = vrot.slane %v69_v46, 7  ;;  %v65_v50 = vld [vmem:[%s64_s0] sm:$0x1]  ;;  %331 = vmatpush.bf16.msrb.mxu0 %v646_v48  ;;  %v59_v46 = vld [vmem:[%s931_s2 + $0x2] sm:$0x3] }
  0x14   :  { %v90_v13 = vpack.c.bf16 %v88_v11, %v88_v11  ;;  %262 = vmatpush.bf16.msrb.mxu2 %v642_v51  ;;  %298 = vmatpush.bf16.msrb.mxu3 %v644_v54  ;;  %v304_v10 = vld [vmem:[%s937_s8] sm:$0x3]  ;;  %61 = vst.msk [vmem:[#allocation3 + $0x2] sm:$0x3] %vm55_vm0, %v59_v46 }
  0x15   :  { %v89_v14 = vsel %vm73_vm1, %v80_v9, %v85_v12  ;;  %v74_v52 = vsel %vm73_vm1, %v65_v50, %v71_v49  ;;  %v58_v9 = vld [vmem:[%s931_s2] sm:$0x3]  ;;  %v337_v11 = vperm.slane %v304_v10, 0  ;;  %v429_v47 = vperm.slane %v304_v10, 1  ;;  %s729_s2 = smov 96  }
  0x16   :  { %571 = vmatmul.msk.bf16.vlgmr.msra.gmra.mxu0 %vm112_vm2, %v90_v13  ;;  %v91_v15 = vpack.c.bf16 %v89_v14, %v89_v14  ;;  %v75_v53 = vpack.c.bf16 %v74_v52, %v74_v52  ;;  %60 = vst.msk [vmem:[#allocation3] sm:$0x3] %vm55_vm0, %v58_v9 }
  0x18   :  { %580 = vmatmul.msk.bf16.vlgmr.msra.gmra.mxu1 %vm112_vm2, %v91_v15 }
  0x26   :  { %613 = vmatmul.msk.bf16.vlgmr.msrb.gmra.mxu0 %vm112_vm2, %v75_v53  ;;  %v452_v53 = vld [vmem:[#allocation3 + $0x2] sm:$0x3] }
  0x93   :  { %v125_v16 = vpop.f32.mrf.mxu0 }
  0x94   :  { %v158_v20 = vsel %vm157_vm3, %v125_v16, -inf }
  0x95   :  { %v153_v17 = vpop.f32.mrf.mxu1 }
  0x96   :  { %v161_v18 = vsel %vm157_vm3, %v153_v17, -inf }
  0x97   :  { %162 = vmax.xlane.f32.xlu0 %v161_v18 }
  0x9b   :  { %v127_v19 = vpop.f32.mrf.mxu0 }
  0x9c   :  { %v359_v19 = vld [vmem:[#allocation3] sm:$0x3] }
  0x9d   :  { %v155_v21 = vpop.f32.mrf.mxu1 }
  0x9f   :  { %159 = vmax.xlane.f32.xlu0 %v158_v20 }
  0xa3   :  { %v333_v7 = vpop.f32.mrf.mxu0 }
  0xab   :  { %v335_v8 = vpop.f32.mrf.mxu0 }
 0x10a   :  { %v163_v22 = vpop.xlane.xlu0 %162 }
 0x10b   :  { %v165_v23 = vsub.f32 %v153_v17, %v163_v22 }
 0x10d   :  { %v168_v24 = vmul.f32 1.442695, %v165_v23 }
 0x10f   :  { %658 = vpow2.f32 %v168_v24 }
 0x112   :  { %v160_v25 = vpop.xlane.xlu0 %159 }
 0x113   :  { %v164_v26 = vsub.f32 %v125_v16, %v160_v25 }
 0x115   :  { %v659_v27 = vpop.eup %658  ;;  %v166_v28 = vmul.f32 1.442695, %v164_v26 }
 0x116   :  { %v173_v29 = vsel %vm157_vm3, %v659_v27, 0.0 }
 0x117   :  { %660 = vpow2.f32 %v166_v28  ;;  %174 = vadd.xlane.f32.xlu1 %v173_v29 }
 0x11d   :  { %v661_v30 = vpop.eup %660 }
 0x11e   :  { %v170_v31 = vsel %vm157_vm3, %v661_v30, 0.0 }
 0x11f   :  { %171 = vadd.xlane.f32.xlu1 %v170_v31 }
 0x18a   :  { %v175_v36 = vpop.xlane.xlu1 %174 }
 0x18b   :  { %662 = vrcp.f32 %v175_v36 }
 0x191   :  { %v663_v37 = vpop.eup %662 }
 0x192   :  { %v172_v38 = vpop.xlane.xlu1 %171  ;;  %v179_v39 = vmul.f32 %v663_v37, %v659_v27 }
 0x193   :  { %664 = vrcp.f32 %v172_v38 }
 0x194   :  { %v181_v40 = vpack.c.bf16 %v179_v39, %v179_v39 }
 0x196   :  { %582 = vmatmul.msk.bf16.vlgmr.msra.gmra.mxu3 %vm184_vm5, %v181_v40  ;;  %v649_v40 = vld [vmem:[%s935_s6 + $0x18] sm:$0xff] }
 0x197   :  { %422 = vmatpush.bf16.msrb.mxu1 %v649_v40 }
 0x199   :  { %v665_v41 = vpop.eup %664 }
 0x19a   :  { %v178_v42 = vmul.f32 %v665_v41, %v661_v30  ;;  %v648_v41 = vld [vmem:[%s935_s6 + $0x10] sm:$0xff] }
 0x19b   :  { %423 = vmatpush.bf16.msrb.mxu1 %v648_v41 }
 0x19c   :  { %v180_v43 = vpack.c.bf16 %v178_v42, %v178_v42 }
 0x19e   :  { %581 = vmatmul.msk.bf16.vlgmr.msra.gmra.mxu2 %vm184_vm5, %v180_v43 }
 0x219   :  { %v220_v55 = vpop.f32.mrf.mxu3 }
 0x21a   :  { %666 = vtanh.f32 %v220_v55 }
 0x220   :  { %v667_v56 = vpop.eup %666 }
 0x221   :  { %v201_v57 = vpop.f32.mrf.mxu2  ;;  %v222_v58 = vpop.f32.mrf.mxu3  ;;  %v227_v59 = vpack.c.bf16 %v667_v56, %v667_v56 }
 0x222   :  { %668 = vtanh.f32 %v201_v57 }
 0x223   :  { %v235_v60 = vunpack.c.l.b16 %v227_v59 }
 0x225   :  { %v236_v0 = vrot.slane %v235_v60, 7 }
 0x228   :  { %v669_v61 = vpop.eup %668 }
 0x229   :  { %v226_v62 = vpack.c.bf16 %v669_v61, %v669_v61  ;;  %v203_v63 = vpop.f32.mrf.mxu2 }
 0x22b   :  { %v234_v1 = vunpack.c.l.b16 %v226_v62 }
 0x22d   :  { %v238_v2 = vsel %vm237_vm6, %v236_v0, %v234_v1  ;;  %v273_v3 = vrot.slane %v234_v1, 1 }
 0x22e   :  { %v239_v4 = vpack.c.b16 %v238_v2, %v238_v2 }
 0x22f   :  { %v274_v5 = vsel %vm237_vm6, %v235_v60, %v273_v3 }
 0x230   :  { %591 = vmatmul.msk.bf16.vlgmr.msrb.gmra.mxu2 %vm112_vm2, %v239_v4  ;;  %v275_v6 = vpack.c.b16 %v274_v5, %v274_v5 }
 0x232   :  { %604 = vmatmul.msk.bf16.vlgmr.msrb.gmra.mxu3 %vm112_vm2, %v275_v6 }
 0x2b3   :  { %v264_v12 = vpop.f32.mrf.mxu2 }
 0x2b4   :  { %v334_v13 = vadd.f32 %v333_v7, %v264_v12  ;;  %v651_v12 = vld [vmem:[%s938_s9 + $0x8] sm:$0xff] }
 0x2b5   :  { %v300_v14 = vpop.f32.mrf.mxu3  ;;  %517 = vmatpush.bf16.msra.mxu2 %v651_v12 }
 0x2b6   :  { %v338_v15 = vadd.f32 %v337_v11, %v334_v13  ;;  %v650_v13 = vld [vmem:[%s938_s9] sm:$0xff] }
 0x2b8   :  { %670 = vtanh.f32 %v338_v15  ;;  %v614_v20 = vmul.f32 -1.442695, %v338_v15 }
 0x2b9   :  { %518 = vmatpush.bf16.msra.mxu2 %v650_v13 }
 0x2ba   :  { %672 = vpow2.f32 %v614_v20 }
 0x2bb   :  { %v266_v16 = vpop.f32.mrf.mxu2 }
 0x2bd   :  { %v302_v17 = vpop.f32.mrf.mxu3 }
 0x2be   :  { %v671_v18 = vpop.eup %670 }
 0x2bf   :  { %366 = vrot.lane.b32.xlu2 %v671_v18, %s727_s26 }
 0x2c0   :  { %v673_v21 = vpop.eup %672 }
 0x2c1   :  { %v342_v22 = vadd.f32 1.0, %v673_v21 }
 0x2c3   :  { %674 = vrcp.f32 %v342_v22  ;;  %v354_v28 = vand.u32 2147483648, %v342_v22  ;;  %vm348_vm8 = vweird.f32 %v342_v22  ;;  %v352_v29 = vand.u32 2147483647, %v342_v22 }
 0x2c5   :  { %v355_v31 = vor.u32 1.1754944e-38, %v354_v28  ;;  %vm353_vm10 = vcmp.eq.f32.partialorder %v352_v29, 8.507059e+37 }
 0x2c7   :  { %361 = vrot.lane.b32.xlu2 %v359_v19, %s728_s27 }
 0x2c9   :  { %v675_v23 = vpop.eup %674 }
 0x2ca   :  { %v344_v24 = vmul.f32 %v675_v23, %v342_v22  ;;  %vm349_vm7 = vweird.f32 %v675_v23 }
 0x2cb   :  { %vm350_vm9 = vmor %vm348_vm8, %vm349_vm7 }
 0x2cc   :  { %v345_v25 = vsub.f32 1.0, %v344_v24  ;;  %v657_v24 = vld [vmem:[%s939_s10] ss:$0 sm:$0xff] }
 0x2ce   :  { %v346_v26 = vmul.f32 %v675_v23, %v345_v25 }
 0x2d0   :  { %v347_v27 = vadd.f32 %v675_v23, %v346_v26 }
 0x2d2   :  { %v351_v30 = vsel %vm350_vm9, %v675_v23, %v347_v27 }
 0x2d3   :  { %v356_v33 = vsel %vm353_vm10, %v355_v31, %v351_v30 }
 0x319   :  { %v367_v32 = vpop.permute.xlu2 %366 }
 0x31a   :  { %v369_v34 = vmul.f32 %v367_v32, %v356_v33 }
 0x31c   :  { %371 = vrot.lane.b32.xlu0 %v369_v34, %s728_s27 }
 0x321   :  { %v362_v35 = vpop.permute.xlu2 %361 }
 0x322   :  { %v364_v36 = vmul.f32 %v362_v35, %v356_v33 }
 0x38e   :  { %v372_v37 = vpop.permute.xlu0 %371 }
 0x38f   :  { %v374_v38 = vadd.f32 %v372_v37, %v364_v36 }
 0x391   :  { %676 = vtanh.f32 %v374_v38 }
 0x397   :  { %v677_v39 = vpop.eup %676 }
 0x398   :  { %377 = vrot.lane.b32.xlu1 %v677_v39, %s727_s26 }
 0x40a   :  { %v378_v42 = vpop.permute.xlu1 %377 }
 0x40b   :  { %v380_v43 = vmul.f32 %v378_v42, %v356_v33 }
 0x40d   :  { %v392_v44 = vpack.c.bf16 %v380_v43, %v380_v43 }
 0x40f   :  { %399 = vrot.lane.b32.xlu2 %v392_v44, %s728_s27 }
 0x469   :  { %v400_v45 = vpop.permute.xlu2 %399 }
 0x46a   :  { %627 = vmatmul.msk.bf16.vlgmr.msrb.gmra.mxu1 %vm112_vm2, %v400_v45 }
 0x4e7   :  { %v425_v48 = vpop.f32.mrf.mxu1 }
 0x4e8   :  { %v426_v49 = vadd.f32 %v425_v48, %v300_v14 }
 0x4ea   :  { %v430_v50 = vadd.f32 %v429_v47, %v426_v49 }
 0x4ec   :  { %678 = vtanh.f32 %v430_v50  ;;  %v628_v54 = vmul.f32 -1.442695, %v430_v50 }
 0x4ee   :  { %680 = vpow2.f32 %v628_v54 }
 0x4ef   :  { %v427_v51 = vpop.f32.mrf.mxu1 }
 0x4f2   :  { %v679_v52 = vpop.eup %678 }
 0x4f3   :  { %459 = vrot.lane.b32.xlu2 %v679_v52, %s727_s26 }
 0x4f4   :  { %v681_v55 = vpop.eup %680 }
 0x4f5   :  { %v434_v56 = vadd.f32 1.0, %v681_v55 }
 0x4f7   :  { %682 = vrcp.f32 %v434_v56  ;;  %v446_v62 = vand.u32 2147483648, %v434_v56  ;;  %vm440_vm12 = vweird.f32 %v434_v56  ;;  %v444_v63 = vand.u32 2147483647, %v434_v56 }
 0x4f9   :  { %v447_v1 = vor.u32 1.1754944e-38, %v446_v62  ;;  %vm445_vm14 = vcmp.eq.f32.partialorder %v444_v63, 8.507059e+37 }
 0x4fb   :  { %454 = vrot.lane.b32.xlu2 %v452_v53, %s728_s27 }
 0x4fd   :  { %v683_v57 = vpop.eup %682 }
 0x4fe   :  { %v436_v58 = vmul.f32 %v683_v57, %v434_v56  ;;  %vm441_vm11 = vweird.f32 %v683_v57 }
 0x4ff   :  { %vm442_vm13 = vmor %vm440_vm12, %vm441_vm11 }
 0x500   :  { %v437_v59 = vsub.f32 1.0, %v436_v58 }
 0x502   :  { %v438_v60 = vmul.f32 %v683_v57, %v437_v59 }
 0x504   :  { %v439_v61 = vadd.f32 %v683_v57, %v438_v60 }
 0x506   :  { %v443_v0 = vsel %vm442_vm13, %v683_v57, %v439_v61 }
 0x507   :  { %v448_v3 = vsel %vm445_vm14, %v447_v1, %v443_v0 }
 0x54d   :  { %v460_v2 = vpop.permute.xlu2 %459 }
 0x54e   :  { %v462_v4 = vmul.f32 %v460_v2, %v448_v3 }
 0x550   :  { %464 = vrot.lane.b32.xlu0 %v462_v4, %s728_s27 }
 0x555   :  { %v455_v5 = vpop.permute.xlu2 %454 }
 0x556   :  { %v457_v6 = vmul.f32 %v455_v5, %v448_v3 }
 0x558   :  { %382 = vrot.lane.b32.xlu0 %v380_v43, %s728_s27 }
 0x5c2   :  { %v465_v7 = vpop.permute.xlu0 %464 }
 0x5c3   :  { %v467_v8 = vadd.f32 %v465_v7, %v457_v6 }
 0x5c5   :  { %684 = vtanh.f32 %v467_v8  ;;  %480 = vrot.lane.b32.xlu0 %v467_v8, %s729_s2 }
 0x5ca   :  { %v383_v9 = vpop.permute.xlu0 %382 }
 0x5cb   :  { %v685_v10 = vpop.eup %684  ;;  %386 = vst.msk [vmem:[#allocation2] sm:$0x3] %vm55_vm0, %v383_v9 }
 0x5cc   :  { %470 = vrot.lane.b32.xlu2 %v685_v10, %s727_s26 }
 0x5d2   :  { %v528_v11 = vld [vmem:[#allocation2] sm:$0x3] }
 0x5d3   :  { %530 = vst.msk [vmem:[%s941_s12] sm:$0x3] %vm55_vm0, %v528_v11 }
 0x5d4   :  { %388 = vrot.lane.b32.xlu2 %v374_v38, %s729_s2 }
 0x626   :  { %v471_v14 = vpop.permute.xlu2 %470 }
 0x627   :  { %v473_v15 = vmul.f32 %v471_v14, %v448_v3 }
 0x629   :  { %v484_v16 = vpack.c.bf16 %v473_v15, %v473_v15 }
 0x62b   :  { %494 = vrot.lane.b32.xlu1 %v484_v16, %s728_s27 }
 0x62e   :  { %v389_v17 = vpop.permute.xlu2 %388 }
 0x62f   :  { %391 = vst.msk [vmem:[#allocation3] sm:$0x3] %vm55_vm0, %v389_v17 }
 0x633   :  { %475 = vrot.lane.b32.xlu1 %v473_v15, %s728_s27 }
 0x636   :  { %v532_v18 = vld [vmem:[#allocation3] sm:$0x3] }
 0x637   :  { %534 = vst.msk [vmem:[%s942_s13] sm:$0x3] %vm55_vm0, %v532_v18  ;;  %v481_v19 = vpop.permute.xlu0 %480 }
 0x638   :  { %483 = vst.msk [vmem:[#allocation3 + $0x2] sm:$0x3] %vm55_vm0, %v481_v19 }
 0x63f   :  { %v533_v20 = vld [vmem:[#allocation3 + $0x2] sm:$0x3] }
 0x640   :  { %535 = vst.msk [vmem:[%s942_s13 + $0x2] sm:$0x3] %vm55_vm0, %v533_v20 }
 0x69d   :  { %v495_v21 = vpop.permute.xlu1 %494 }
 0x69e   :  { %637 = vmatmul.msk.bf16.vlgmr.msra.gmra.mxu2 %vm112_vm2, %v495_v21 }
 0x6a5   :  { %v476_v22 = vpop.permute.xlu1 %475 }
 0x6a6   :  { %478 = vst.msk [vmem:[#allocation2 + $0x2] sm:$0x3] %vm55_vm0, %v476_v22 }
 0x6ad   :  { %v529_v23 = vld [vmem:[#allocation2 + $0x2] sm:$0x3] }
 0x6ae   :  { %531 = vst.msk [vmem:[%s941_s12 + $0x2] sm:$0x3] %vm55_vm0, %v529_v23 }
 0x721   :  { %v520_v25 = vpop.f32.mrf.mxu2 }
 0x722   :  { %v521_v26 = vadd.f32 %v657_v24, %v520_v25 }
 0x724   :  { %524 = vst [vmem:[#allocation6] sm:$0x3] %v521_v26 }
 0x725   :  { %546 = dma.vmem_to_hbm [thread:$0]  %s542_s23, 32, %s544_s25, [#allocation7]  }
 0x729   :  { %v522_v27 = vpop.f32.mrf.mxu2 }
 0x72a   :  { %724 = dma.done.wait [#allocation7], 32  }
 0x72b   :  { %725 = vsyncadd [#allocation7], 4294967264 }
 0x72c   :  { %559 = vsyncpa [#allocation7], 1 }

</bundles_post_ra>
